<compile_context>
chip_gen: v7x
topology: tpu7x:2x2x1
jax: 0.10.0
libtpu: 0.0.40
codegen_flags: <defaults>
</compile_context>

<pallas_src>
import functools

import jax
import jax.numpy as jnp
from jax.experimental import pallas as pl
from jax.experimental.pallas import tpu as pltpu


def _scale_norm_kernel(g_ref, x_ref, o_ref, *, eps, native_multiply):
    # x_ref: (tile_rows, dim) block in VMEM; per-row L2-norm scaling.
    x = x_ref[...]
    x32 = x.astype(jnp.float32)
    sq_sum = jnp.sum(x32 * x32, axis=-1, keepdims=True)        # f32 accumulation
    # 1 / clamp(||x||, eps) == min(rsqrt(sum x^2), 1/eps); rsqrt(0)=+inf -> 1/eps.
    inv = jnp.minimum(jax.lax.rsqrt(sq_sum), jnp.float32(1.0 / eps))
    scale = g_ref[0] * inv                                      # (tile_rows, 1) f32
    if native_multiply:
        # 16-bit dtypes: final multiply in native dtype so the f32 copy of the
        # tile dies right after the reduction (halves live tile bytes).
        o_ref[...] = x * scale.astype(x.dtype)
    else:
        o_ref[...] = (x32 * scale).astype(o_ref.dtype)


def _sublane_multiple(dtype) -> int:
    # 8 rows per sublane tile for 32-bit dtypes, 16 for 16-bit, 32 for 8-bit.
    return max(8, 32 // jnp.dtype(dtype).itemsize)


def _round_up(n: int, m: int) -> int:
    return ((n + m - 1) // m) * m


def _tpu_vmem_bytes() -> int:
    try:
        info = pltpu.get_tpu_info()
        vmem = int(info.vmem_capacity_bytes)
        if vmem > 0:
            return vmem
    except Exception:
        pass
    return 64 * 1024 * 1024  # conservative default: assume the tightest (v7x) VMEM


def scale_norm(x, g, eps=1e-5, *, vmem_budget_bytes=None):
    """ScaleNorm forward: g * x / clamp(||x||_2(last dim), eps).

    x: any shape (..., dim). g: scalar learnable gain (shape (1,) or ()).
    """
    orig_shape = x.shape
    dim = orig_shape[-1]
    rows = 1
    for s in orig_shape[:-1]:
        rows *= s
    x2d = x.reshape(rows, dim)

    itemsize = jnp.dtype(x.dtype).itemsize
    sub = _sublane_multiple(x.dtype)

    # Generation-aware VMEM sizing.
    vmem_bytes = _tpu_vmem_bytes()
    two_cores = vmem_bytes < 100 * 1024 * 1024          # v7x: 64 MiB VMEM, 2 TCs
    if vmem_budget_bytes is not None:
        resident_budget = int(vmem_budget_bytes)
        limit_cap = min(max(2 * resident_budget, 8 * 1024 * 1024),
                        (vmem_bytes * 3) // 4)
    elif two_cores:
        resident_budget = 32 * 1024 * 1024               # v7x (64 MiB physical)
        limit_cap = 48 * 1024 * 1024
    else:
        resident_budget = 64 * 1024 * 1024               # v5e / v6e (128 MiB physical)
        limit_cap = 96 * 1024 * 1024

    # Per-row resident bytes: in + out blocks, each double-buffered (4x native
    # tile), plus the transient f32 copy used by the sum-of-squares reduction.
    row_bytes = dim * (4 * itemsize + 4)

    if sub * row_bytes > resident_budget:
        # TODO(synk): dim-chunked two-pass Pallas path (partial sq-sum scratch)
        # for rows so wide that even one sublane tile busts VMEM.
        return scale_norm_ref(x, g, eps)

    # Byte-budgeted row tile (no fixed row ceiling), rounded to the sublane
    # multiple and clamped to the (padded) row count.
    tr = max(sub, (resident_budget // row_bytes) // sub * sub)
    tr = min(tr, _round_up(rows, sub))

    # Only split work on 2-TensorCore parts (v7x); aim for >= 4 grid steps so
    # both cores stay balanced under dimension_semantics=("parallel",).
    if two_cores and rows > sub and pl.cdiv(rows, tr) < 4:
        tr = min(tr, max(sub, _round_up(pl.cdiv(rows, 4), sub)))

    grid = (pl.cdiv(rows, tr),)  # ragged last block handled by Pallas (no host pad)

    tile_bytes = tr * dim * itemsize
    needed = 4 * tile_bytes + tr * dim * 4 + (2 << 20)   # dbl-buffered io + f32 temp + slack
    vmem_limit = int(min(limit_cap, max(8 * 1024 * 1024, needed)))

    g_arr = jnp.asarray(g, dtype=jnp.float32).reshape(1)
    native_multiply = itemsize < 4
    kernel = functools.partial(_scale_norm_kernel, eps=float(eps),
                               native_multiply=native_multiply)

    out = pl.pallas_call(
        kernel,
        out_shape=jax.ShapeDtypeStruct((rows, dim), x.dtype),
        grid_spec=pltpu.PrefetchScalarGridSpec(
            num_scalar_prefetch=0,
            grid=grid,
            in_specs=[
                pl.BlockSpec(memory_space=pltpu.SMEM),       # g (scalar gain)
                pl.BlockSpec((tr, dim), lambda i: (i, 0)),   # x tile
            ],
            out_specs=pl.BlockSpec((tr, dim), lambda i: (i, 0)),
        ),
        compiler_params=pltpu.CompilerParams(
            dimension_semantics=("parallel",),
            vmem_limit_bytes=vmem_limit,
        ),
    )(g_arr, x2d)

    return out.reshape(orig_shape)


def scale_norm_ref(x, g, eps=1e-5):
    """Pure-JAX reference matching the PyTorch forward."""
    norm = jnp.sqrt(jnp.sum(x.astype(jnp.float32) ** 2, axis=-1, keepdims=True))
    norm = jnp.maximum(norm, eps)
    g32 = jnp.asarray(g, jnp.float32)
    return (g32 * x.astype(jnp.float32) / norm).astype(x.dtype)


if __name__ == "__main__":
    key = jax.random.PRNGKey(0)
    batch, seq, hidden = 2, 8, 32

    x = jax.random.normal(key, (batch, seq, hidden), dtype=jnp.float32)

    # Parameter init mirrors nn.Parameter(torch.ones(1) * dim**0.5)
    g = jnp.ones((1,), dtype=jnp.float32) * (hidden ** 0.5)
    eps = 1e-5

    out = scale_norm(x, g, eps)
    out = jax.block_until_ready(out)

    expected = scale_norm_ref(x, g, eps)
    assert out.shape == x.shape
    assert jnp.allclose(out, expected, atol=1e-5, rtol=1e-5), (
        float(jnp.max(jnp.abs(out - expected)))
    )

    print("KERNEL_OK")
</pallas_src>

<mosaic_0001>
module attributes {stable_mosaic.version = 11 : i64} {
  func.func @_scale_norm_kernel(%arg0: i32, %arg1: memref<1xf32, #tpu.memory_space<smem>>, %arg2: memref<8x32xf32, #tpu.memory_space<vmem>>, %arg3: memref<8x32xf32, #tpu.memory_space<vmem>>) attributes {dimension_semantics = [#tpu.dimension_semantics<parallel>], iteration_bounds = array<i64: 2>, scalar_prefetch = 0 : i64, scratch_operands = 0 : i64, tpu.core_type = #tpu.core_type<tc>, window_params = [{transform_indices = @transform_0, window_bounds = array<i64: 1>}, {transform_indices = @transform_1, window_bounds = array<i64: 8, 32>}, {transform_indices = @transform_2, window_bounds = array<i64: 8, 32>}]} {
    %c0 = arith.constant 0 : index
    %c0_0 = arith.constant 0 : index
    %0 = vector.load %arg2[%c0, %c0_0] : memref<8x32xf32, #tpu.memory_space<vmem>>, vector<8x32xf32>
    %1 = arith.mulf %0, %0 : vector<8x32xf32>
    %cst = arith.constant dense<0.000000e+00> : vector<8xf32>
    %2 = vector.multi_reduction <add>, %1, %cst [1] : vector<8x32xf32> to vector<8xf32>
    %3 = vector.shape_cast %2 : vector<8xf32> to vector<8x1xf32>
    %4 = math.rsqrt %3 : vector<8x1xf32>
    %cst_1 = arith.constant 1.000000e+05 : f32
    %5 = vector.broadcast %cst_1 : f32 to vector<8x1xf32>
    %6 = arith.minimumf %4, %5 : vector<8x1xf32>
    %c0_2 = arith.constant 0 : index
    %7 = memref.load %arg1[%c0_2] : memref<1xf32, #tpu.memory_space<smem>>
    %8 = vector.broadcast %7 : f32 to vector<8x1xf32>
    %9 = arith.mulf %8, %6 : vector<8x1xf32>
    %10 = vector.broadcast %9 : vector<8x1xf32> to vector<8x32xf32>
    %11 = arith.mulf %0, %10 : vector<8x32xf32>
    %c0_3 = arith.constant 0 : index
    %c0_4 = arith.constant 0 : index
    %12 = vector.load %arg3[%c0_3, %c0_4] : memref<8x32xf32, #tpu.memory_space<vmem>>, vector<8x32xf32>
    tpu.vector_store %arg3[%c0_3, %c0_4], %11 {strides = array<i32>} : memref<8x32xf32, #tpu.memory_space<vmem>>, vector<8x32xf32>,
    return
  }
  func.func @transform_0(%arg0: i32) -> i32 {
    %c0_i32 = arith.constant 0 : i32
    %c0_i32_0 = arith.constant 0 : i32
    return %c0_i32 : i32
  }
  func.func @transform_1(%arg0: i32) -> (i32, i32) {
    %c0_i32 = arith.constant 0 : i32
    %c0_i32_0 = arith.constant 0 : i32
    return %arg0, %c0_i32 : i32, i32
  }
  func.func @transform_2(%arg0: i32) -> (i32, i32) {
    %c0_i32 = arith.constant 0 : i32
    %c0_i32_0 = arith.constant 0 : i32
    return %arg0, %c0_i32 : i32, i32
  }
}

</mosaic_0001>

<bundles_post_ra>
// kernel: tpu_custom_call.1
= control target key start
LH: loop header
LB: loop body
LE: loop exit
PB: predicated region body
PF: predicated region fallthrough
CT: control target
= control target key end

     0   :  { %s598_s0 = inlined_call_operand.<no memory space> [shape: f32[1], index: 0, kind: input, shape index: {}]   ;;  %s599_s1 = inlined_call_operand.hbm [shape: f32[16,32], index: 1, kind: input, shape index: {}]   ;;  %s600_s2 = inlined_call_operand.hbm [shape: f32[16,32], index: 2, kind: output, shape index: {}]  }
   0x1   :  { %7 = sst [smem:[#allocation2]] %s598_s0 }
   0x2   :  { %8 = vsyncpa [#allocation4], 0 }
   0x3   :  { %10 = vsyncpa [#allocation4 + $0x1], 0 }
   0x4   :  { %11 = vsyncpa [#allocation5], 0 }
   0x5   :  { %13 = vsyncpa [#allocation5 + $0x1], 0  ;;  %s435_s11 = smov 0   ;;  %s437_s12 = smov 0  }
   0x6   :  { %s439_s13 = smov 0   ;;  %s441_s14 = smov 0  }
   0x7 LB: > { %s456_s0 = sadd.s32 4294967295, %s413_s14   ;;  %s257_s15 = sadd.s32 4294967294, %s413_s14   ;;  %s413_s14 = sphi %s441_s14, %s615_s14   ;;  %s409_s13 = sphi %s439_s13, %s614_s13   ;;  %s405_s12 = sphi %s437_s12, %s613_s12   ;;  %s401_s11 = sphi %s435_s11, %s612_s11  }
   0x8   : > { %s460_s16 = sadd.s32 1, %s413_s14   ;;  %s47_s17 = sadd.s32 1, %s409_s13 }
   0x9   : > { %s44_s18 = ssub.s32 %s413_s14, %s460_s16  ;;  %p54_p0 = scmp.ne.s32.totalorder %s409_s13, %s405_s12 }
   0xa   : > { %p45_p1 = scmp.eq.s32.totalorder %s44_s18, 0  ;;  %p55_p2 = scmp.eq.s32.totalorder %s413_s14, 0 }
   0xb   : > { %p60_p3 = scmp.ne.s32.totalorder %s405_s12, %s401_s11  ;;  %p61_p4 = scmp.eq.s32.totalorder %s456_s0, 0 }
   0xc   : > { %s472_s19 = scalar_select %p45_p1, %s409_s13, %s47_s17  }
   0xd   : > { %p474_p5 = por %p55_p2, %p54_p0  ;;  %p478_p6 = por %p61_p4, %p60_p3 }
   0xe   : > { %p84_p7 = scmp.eq.s32.totalorder %s456_s0, 1  ;;  %p90_p8 = scmp.eq.s32.totalorder %s257_s15, 1 }
   0xf   : > { %p281_p10 = scmp.lt.s32.totalorder %s413_s14, 2  ;;  %s113_s24 = sand.u32 1, %s409_s13  }
  0x10   : > { %p485_p11 = por %p84_p7, %p54_p0  ;;  %p489_p12 = por %p90_p8, %p60_p3 }
  0x11   : > { %s261_s25 = sshll.u32 %s413_s14, 7  ;;  %s260_s26 = sshll.u32 %s113_s24, 3 }
  0x12   : > { %s604_s22 = scalar_select %p485_p11, 1, 0 }
  0x13   : > { %s605_s23 = scalar_select %p489_p12, 1, 0 }
  0x14   : > { %s498_s29 = scalar_lea.hbm %s599_s1, %s261_s25  ;;  %s117_s30 = scalar_lea.vmem [#allocation3], %s260_s26 }
  0x15   : > { %s124_s3 = sshll.u32 %s117_s30, 4  ;;  %p502_p13 = pnand %p281_p10, %p474_p5  ;;  %s506_s3 = int_to_ptr.vmem [resolvable:$true] %s124_s3 }
  0x16   : > { %s114_s5 = scalar_lea.sflag [#allocation4], %s113_s24  ;;  %s317_s6 = scalar_lea.hbm %s498_s29, 128 }
  0x17   : > { %p318_p2 = scmp.ne.s32.totalorder %s498_s29, %s317_s6  ;;  %p319_p3 = pneg %p502_p13 }
  0x18   : > { %s322_s9 = scalar_lea.hbm %s599_s1, 256  ;;  %p323_p5 = scmp.lt.u32.totalorder %s498_s29, %s599_s1 }
  0x19   : > { %p320_p4 = pnand %p319_p3, %p318_p2  ;;  %p324_p8 = scmp.lt.u32.totalorder %s322_s9, %s317_s6 }
  0x1a   : > { %p326_p9 = scmp.lt.u32.totalorder %s317_s6, %s498_s29 }
  0x1b   : > { %p321_p7 = pneg %p320_p4  ;;  %p325_p10 = por %p324_p8, %p323_p5 }
  0x1d   : > { %p327_p0 = por %p326_p9, %p325_p10 }
  0x1f   : > { %p328_p1 = pnand %p327_p0, %p321_p7 }
  0x21   : > { %331 = shalt.err (!%p328_p1)
}
  0x22   : > { %s332_s17 = scalar_lea.vmem %s506_s3, 128  ;;  %s415_s18 = smov [#allocation3]  }
  0x23   : > { %p333_p2 = scmp.ne.s32.totalorder %s506_s3, %s332_s17  ;;  %s337_s20 = sshll.u32 %s415_s18, 4  ;;  %s338_s20 = int_to_ptr.vmem [resolvable:$false] %s337_s20 }
  0x24   : > { %s339_s24 = scalar_lea.vmem %s338_s20, 256  ;;  %p340_p11 = scmp.lt.s32.totalorder %s506_s3, %s338_s20 }
  0x25   : > { %p335_p4 = pnand %p333_p2, %p319_p3  ;;  %p341_p5 = scmp.lt.s32.totalorder %s339_s24, %s332_s17 }
  0x27   : > { %p336_p12 = pneg %p335_p4  ;;  %p342_p8 = por %p341_p5, %p340_p11 }
  0x29   : > { %p343_p9 = pnand %p342_p8, %p336_p12 }
  0x2b   : > { %346 = shalt.err (!%p343_p9)
}
  0x2c   : > { %276 = dma.hbm_to_vmem [thread:$0]  (!%p502_p13), %s498_s29, 128, %s506_s3, %s114_s5  }
  0x2d   : > { %p607_p0 = scmp.lt.s32.totalorder %s413_s14, 3  ;;  %p608_p1 = scmp.ge.s32.totalorder %s413_s14, 1 }
  0x2f   : > { %p130_p3 = pnand %p608_p1, %p607_p0 }
  0x30   : > { %s540_s25 = sand.u32 (!%p130_p3), 1, %s405_s12  }
  0x31   : > { %133 = sbr.rel (%p130_p3) target bundleno = 234 (0xea), region = 28  ;;  %s263_s26 = sshll.u32 (!%p130_p3), %s540_s25, 3 }
  0x32   : > { %s136_s27 = scalar_lea.sflag (!%p130_p3), [#allocation4], %s540_s25  ;;  %s139_s28 = scalar_lea.vmem (!%p130_p3), [#allocation3], %s263_s26 }
  0x38   : > { %392 = dma.done.wait (%p478_p6), %s136_s27, 128  }
  0x39   : > { %394 = vsyncadd (%p478_p6), %s136_s27, 4294967168  ;;  %v160_v0 = vld [vmem:[%s139_s28] sm:$0xff]  ;;  %vm162_vm0 = vcmask 261120   ;;  %s168_s29 = sld [smem:[#allocation2]]  ;;  %s266_s30 = sshll.u32 %s456_s0, 7 }
  0x3a   : > { %v161_v1 = vmul.f32 %v160_v0, %v160_v0  ;;  %s159_s3 = scalar_lea.vmem [#allocation6], %s263_s26  ;;  %s553_s6 = scalar_lea.hbm %s600_s2, %s266_s30 }
  0x3b   : > { %s187_s4 = sshll.u32 %s159_s3, 4  ;;  %s174_s7 = scalar_lea.sflag [#allocation5], %s540_s25  ;;  %s555_s4 = int_to_ptr.vmem [resolvable:$true] %s187_s4 }
  0x3c   : > { %v163_v2 = vsel %vm162_vm0, %v161_v1, 0.0  ;;  %s347_s8 = scalar_lea.vmem %s555_s4, 128  ;;  %p609_p11 = scmp.ne.s32.totalorder %s604_s22, 0 }
  0x3d   : > { %164 = vadd.xlane.f32.xlu0 %v163_v2  ;;  %p348_p6 = scmp.ne.s32.totalorder %s555_s4, %s347_s8  ;;  %s416_s0 = smov [#allocation6]  }
  0x3e   : > { %s351_s9 = sshll.u32 %s416_s0, 4  ;;  %s352_s9 = int_to_ptr.vmem [resolvable:$false] %s351_s9 }
  0x3f   : > { %v169_v5 = vstv %s168_s29  ;;  %p349_p12 = pnand %p348_p6, %p609_p11  ;;  %s353_s10 = scalar_lea.vmem %s352_s9, 256 }
  0x40   : > { %p354_p7 = scmp.lt.s32.totalorder %s555_s4, %s352_s9  ;;  %p355_p10 = scmp.lt.s32.totalorder %s353_s10, %s347_s8 }
  0x41   : > { %p350_p13 = pneg %p349_p12 }
  0x42   : > { %p356_p2 = por %p355_p10, %p354_p7 }
  0x44   : > { %p357_p4 = pnand %p356_p2, %p350_p13 }
  0xca   : > { %v165_v3 = vpop.xlane.xlu0 %164 }
  0xcb   : > { %315 = vrsqrt.f32 %v165_v3 }
  0xd5   : > { %v316_v4 = vpop.eup %315 }
  0xd6   : > { %v167_v6 = vmin.f32 %v316_v4, 100000.0 }
  0xd8   : > { %v170_v7 = vmul.f32 %v169_v5, %v167_v6 }
  0xda   : > { %v171_v8 = vmul.f32 %v170_v7, %v160_v0 }
  0xdc   : > { %172 = vst.msk [vmem:[%s159_s3] sm:$0xff] %vm162_vm0, %v171_v8 }
  0xdd   : > { %360 = shalt.err (!%p357_p4)
}
  0xde   : > { %s361_s15 = scalar_lea.hbm %s553_s6, 128  ;;  %s365_s20 = scalar_lea.hbm %s600_s2, 256 }
  0xdf   : > { %p362_p5 = scmp.ne.s32.totalorder %s553_s6, %s361_s15  ;;  %p366_p0 = scmp.lt.u32.totalorder %s553_s6, %s600_s2 }
  0xe0   : > { %p367_p1 = scmp.lt.u32.totalorder %s365_s20, %s361_s15  ;;  %p369_p6 = scmp.lt.u32.totalorder %s361_s15, %s553_s6 }
  0xe1   : > { %p363_p8 = pnand %p362_p5, %p609_p11 }
  0xe2   : > { %p368_p3 = por %p367_p1, %p366_p0 }
  0xe3   : > { %p364_p9 = pneg %p363_p8 }
  0xe4   : > { %p370_p12 = por %p369_p6, %p368_p3 }
  0xe6   : > { %p371_p13 = pnand %p370_p12, %p364_p9 }
  0xe8   : > { %374 = shalt.err (!%p371_p13)
}
  0xe9   : > { %271 = dma.vmem_to_hbm [thread:$0]  (%p609_p11), %s555_s4, 128, %s553_s6, %s174_s7  }
  0xea PF: > { %s199_s26 = sand.u32 1, %s401_s11   ;;  %p610_p7 = scmp.ne.s32.totalorder %s605_s23, 0 }
  0xeb   : > { %p611_p10 = scmp.ge.s32.totalorder %s413_s14, 2  ;;  %s200_s27 = scalar_lea.sflag [#allocation5], %s199_s26 }
  0xed   : > { %p278_p2 = pnand %p611_p10, %p610_p7 }
  0xef   : > { %396 = dma.done.wait (!%p278_p2), %s200_s27, 128  }
  0xf0   : > { %398 = vsyncadd (!%p278_p2), %s200_s27, 4294967168  ;;  %p16_p4 = scmp.ge.s32.totalorder %s460_s16, 4   ;;  %s612_s11 = smov %s405_s12 }
  0xf1   : > { %s613_s12 = smov %s409_s13  ;;  %s614_s13 = smov %s472_s19 }
  0xf2   : > { %s615_s14 = smov %s460_s16  ;;  %18 = sbr.rel (!%p16_p4) target bundleno = 7 (0x7), region = 73 }
  0xf9   :  { %205 = vsyncpa [#allocation4], 1 }
  0xfa   :  { %207 = vsyncpa [#allocation4 + $0x1], 1 }
  0xfb   :  { %208 = vsyncpa [#allocation5], 1 }
  0xfc   :  { %210 = vsyncpa [#allocation5 + $0x1], 1 }

</bundles_post_ra>
